<compile_context>
chip_gen: v7x
topology: tpu7x:2x2x1
jax: 0.10.0
libtpu: 0.0.40
codegen_flags: <defaults>
</compile_context>

<pallas_src>
import functools

import jax
import jax.numpy as jnp
from jax import lax
from jax.experimental import pallas as pl
from jax.experimental.pallas import tpu as pltpu


def _mlp_sigmoid(avg, mx, w1t, w2t, o_ref):
    """Fused avg/max MLP branches + sigmoid, stored lane-dense into o_ref."""
    nb = avg.shape[0]
    pooled = jnp.concatenate([avg, mx], axis=0)                      # (2*Nb, C)
    h = jnp.maximum(
        jnp.dot(pooled, w1t, preferred_element_type=jnp.float32), 0.0)
    out = jnp.dot(h, w2t, preferred_element_type=jnp.float32)        # (2*Nb, C)
    res = jax.nn.sigmoid(out[:nb] + out[nb:])                        # (Nb, C)
    o_ref[...] = res[:, None, :].astype(o_ref.dtype)


def _channel_attention_kernel(x_ref, w1t_ref, w2t_ref, o_ref, *scratch,
                              inv_hw, hw, hw_t, defer_reduce, needs_mask):
    # x_ref:   (Nb, C, hw_t)  current x tile (native dtype)
    # w1t_ref: (C, C_hid)     fc1 weight, transposed (Conv2d 1x1, no bias)
    # w2t_ref: (C_hid, C)     fc2 weight, transposed
    # o_ref:   (Nb, 1, C)     lane-dense output
    # scratch: () or (sum_acc, max_acc) each (Nb, C, 128) f32 (deferred reduce)
    nb = o_ref.shape[0]

    if not defer_reduce:
        # Single full-HW tile per batch group (HW not a multiple of 128, e.g.
        # HW < 128): direct lane reductions; finalize immediately.
        x = x_ref[...].astype(jnp.float32)                 # (Nb, C, HW)
        avg = jnp.sum(x, axis=-1) * inv_hw
        mx = jnp.max(x, axis=-1)
        _mlp_sigmoid(avg, mx, w1t_ref[...], w2t_ref[...], o_ref)
        return

    sum_acc, max_acc = scratch
    k = pl.program_id(1)
    last = pl.num_programs(1) - 1
    n_slices = hw_t // 128

    @pl.when(k == 0)
    def _init():
        sum_acc[...] = jnp.zeros(sum_acc.shape, sum_acc.dtype)
        max_acc[...] = jnp.full(max_acc.shape, -jnp.inf, max_acc.dtype)

    def _accumulate(masked):
        # Fold the HW tile in 128-lane slices: pure VPU add/max, no XLU.
        ps = None
        pm = None
        for j in range(n_slices):
            slab = x_ref[:, :, pl.ds(j * 128, 128)].astype(jnp.float32)
            if masked:
                pos = (k * hw_t + j * 128
                       + lax.broadcasted_iota(jnp.int32, slab.shape, 2))
                valid = pos < hw
                slab_s = jnp.where(valid, slab, 0.0)
                slab_m = jnp.where(valid, slab, -jnp.inf)
            else:
                slab_s = slab
                slab_m = slab
            ps = slab_s if ps is None else ps + slab_s
            pm = slab_m if pm is None else jnp.maximum(pm, slab_m)
        sum_acc[...] = sum_acc[...] + ps
        max_acc[...] = jnp.maximum(max_acc[...], pm)

    if needs_mask:
        # Only the last HW tile can run past the end of the array.
        @pl.when(k < last)
        def _steady():
            _accumulate(False)

        @pl.when(k == last)
        def _tail():
            _accumulate(True)
    else:
        _accumulate(False)

    @pl.when(k == last)
    def _finalize():
        # One XLU lane-reduce per batch group (not per tile).
        avg = jnp.sum(sum_acc[...], axis=-1) * inv_hw      # (Nb, C)
        mx = jnp.max(max_acc[...], axis=-1)                # (Nb, C)
        _mlp_sigmoid(avg, mx, w1t_ref[...], w2t_ref[...], o_ref)


def _pick_nb(N, C, HW, itemsize, tile_target):
    """Batch elements per grid step."""
    per_item = C * HW * itemsize
    cap = 1 if per_item >= tile_target else max(1, tile_target // per_item)
    if N >= 2:
        # Keep >= 2 batch-grid steps so both v7x TensorCores get work.
        cap = min(cap, max(1, N // 2))
    cap = max(1, min(cap, N))
    best = 1
    best_even = None
    for d in range(1, cap + 1):
        if N % d == 0:
            best = d
            if (N // d) % 2 == 0:
                best_even = d
    # Prefer an even number of batch steps (megacore load balance).
    # TODO(synk): for N == 1, add a 2-wide core split over HW (per-core partial
    # pooled stats combined outside) so the second v7x TensorCore isn't idle.
    return best_even if best_even is not None else best


def _pick_hw_t(HW, nb, C, itemsize, tile_target):
    """HW tile size: full HW if it fits, else a 128-multiple under budget."""
    if nb * C * HW * itemsize <= tile_target or HW <= 128:
        return HW                                   # one contiguous DMA per group
    max_lanes = max(128, tile_target // (nb * C * itemsize))
    hw_t = (max_lanes // 128) * 128
    hw_t = min(hw_t, (HW // 128) * 128)
    hw_t = max(hw_t, 128)
    # Prefer an exact 128-multiple divisor of HW (no masked tail), but only if
    # it keeps DMA rows reasonably long (>= 512 lanes when possible).
    best_div = None
    t = 128
    while t <= hw_t:
        if HW % t == 0:
            best_div = t
        t += 128
    if best_div is not None and best_div >= min(512, hw_t):
        return best_div
    return hw_t                                     # ragged tail, masked in-kernel


def channel_attention(x, w1, w2, *, tile_target=None):
    """x: (N, C, H, W).  w1: (C//16, C) fc1 weight.  w2: (C, C//16) fc2 weight.

    Returns sigmoid(fc2(relu(fc1(avgpool(x)))) + fc2(relu(fc1(maxpool(x)))))
    with shape (N, C, 1, 1), matching the PyTorch ChannelAttention module.
    """
    N, C, H, W = x.shape
    HW = H * W
    C_hid = w1.shape[0]
    assert w1.shape == (C_hid, C) and w2.shape == (C, C_hid)
    assert C_hid >= 1, "in_planes must be >= 16 (module hardcodes // 16)"

    itemsize = x.dtype.itemsize
    out_dtype = x.dtype

    # Generation-aware budgets (v7x has 64 MiB VMEM; v5e/v6e have 128 MiB).
    try:
        info = pltpu.get_tpu_info()
        vmem_phys = int(getattr(info, "vmem_capacity_bytes", 64 << 20))
    except Exception:
        vmem_phys = 64 << 20                       # conservative (v7x per-TC)
    usable = (vmem_phys * 3) // 4                  # ~48 MiB v7x, ~96 MiB v5e/v6e
    if tile_target is None:
        tile_target = min(16 << 20, usable // 6)   # ~8 MiB v7x, ~16 MiB v5e/v6e

    nb = _pick_nb(N, C, HW, itemsize, tile_target)
    hw_t = _pick_hw_t(HW, nb, C, itemsize, tile_target)
    assert N % nb == 0

    defer_reduce = (hw_t % 128 == 0)               # False only when hw_t == HW
    needs_mask = (HW % hw_t) != 0                  # ragged last HW tile
    grid_hw = pl.cdiv(HW, hw_t)
    if not defer_reduce:
        assert hw_t == HW and grid_hw == 1 and not needs_mask

    # Native-dtype stream (no wrapper upcast); weights tiny, kept f32-resident.
    x_flat = x.reshape(N, C, HW)
    w1_t = jnp.asarray(w1, jnp.float32).T          # (C, C_hid)
    w2_t = jnp.asarray(w2, jnp.float32).T          # (C_hid, C)

    if defer_reduce:
        scratch_shapes = [pltpu.VMEM((nb, C, 128), jnp.float32),   # running sum
                          pltpu.VMEM((nb, C, 128), jnp.float32)]   # running max
        scratch_bytes = 2 * nb * C * 128 * 4
    else:
        scratch_shapes = []
        scratch_bytes = 0

    # Explicit VMEM limit from the actual footprint (double-buffered stream).
    x_tile_bytes = nb * C * hw_t * itemsize
    w_bytes = 2 * C * C_hid * 4
    out_tile_bytes = nb * C * jnp.dtype(out_dtype).itemsize
    footprint = 2 * x_tile_bytes + 2 * w_bytes + 2 * out_tile_bytes + scratch_bytes
    vmem_limit = int(min(usable, max(footprint + (4 << 20), 16 << 20)))

    # Tell XLA this is a big memory-bound op.
    bytes_accessed = (N * C * HW * itemsize + 2 * C * C_hid * 4
                      + N * C * jnp.dtype(out_dtype).itemsize)
    flops = 2 * N * C * HW + 8 * N * C * C_hid
    transcendentals = 2 * N * C

    kernel = functools.partial(
        _channel_attention_kernel,
        inv_hw=1.0 / HW, hw=HW, hw_t=hw_t,
        defer_reduce=defer_reduce, needs_mask=needs_mask)

    out = pl.pallas_call(
        kernel,
        out_shape=jax.ShapeDtypeStruct((N, 1, C), out_dtype),
        grid_spec=pltpu.PrefetchScalarGridSpec(
            num_scalar_prefetch=0,
            grid=(N // nb, grid_hw),
            in_specs=[
                pl.BlockSpec((nb, C, hw_t), lambda n, k: (n, 0, k)),
                pl.BlockSpec((C, C_hid), lambda n, k: (0, 0)),    # resident
                pl.BlockSpec((C_hid, C), lambda n, k: (0, 0)),    # resident
            ],
            out_specs=pl.BlockSpec((nb, 1, C), lambda n, k: (n, 0, 0)),
            scratch_shapes=scratch_shapes,
        ),
        compiler_params=pltpu.CompilerParams(
            dimension_semantics=("parallel", "arbitrary"),
            vmem_limit_bytes=vmem_limit),
        cost_estimate=pl.CostEstimate(
            flops=int(flops),
            transcendentals=int(transcendentals),
            bytes_accessed=int(bytes_accessed)),
    )(x_flat, w1_t, w2_t)

    return out.reshape(N, C, 1, 1)


def _reference(x, w1, w2):
    # Pure-JAX reference for sanity checking.
    xf = x.astype(jnp.float32)
    avg = jnp.mean(xf, axis=(2, 3))                  # (N, C)
    mx = jnp.max(xf, axis=(2, 3))                    # (N, C)

    def branch(p):
        h = jnp.maximum(p @ w1.T, 0.0)               # (N, C_hid)
        return h @ w2.T                              # (N, C)

    out = jax.nn.sigmoid(branch(avg) + branch(mx))
    return out[:, :, None, None]


if __name__ == "__main__":
    # in_planes must be >= 16 so that in_planes // 16 >= 1 (module hardcodes 16).
    N, C, H, W = 2, 32, 16, 16
    C_hid = C // 16

    key = jax.random.PRNGKey(0)
    kx, k1, k2 = jax.random.split(key, 3)
    x = jax.random.normal(kx, (N, C, H, W), dtype=jnp.float32)
    # Deterministic synthetic weights (Conv2d 1x1, no bias -> plain matrices).
    w1 = jax.random.normal(k1, (C_hid, C), dtype=jnp.float32) * 0.1   # fc1
    w2 = jax.random.normal(k2, (C, C_hid), dtype=jnp.float32) * 0.1   # fc2

    # Main path: full-HW contiguous tile, deferred reduction, no masking.
    out = jax.block_until_ready(channel_attention(x, w1, w2))
    ref = _reference(x, w1, w2)
    assert out.shape == (N, C, 1, 1)
    assert jnp.allclose(out, ref, atol=1e-5, rtol=1e-5)

    # HW not a multiple of 128 -> single ragged full-HW tile (direct reduce).
    x2 = jax.random.normal(kx, (2, 32, 12, 12), dtype=jnp.float32)     # HW=144
    out2 = jax.block_until_ready(channel_attention(x2, w1, w2))
    assert jnp.allclose(out2, _reference(x2, w1, w2), atol=1e-5, rtol=1e-5)

    # Forced HW tiling (tiny budget): exact 128-divisor tiles, multi-step reduce.
    out3 = jax.block_until_ready(channel_attention(x, w1, w2, tile_target=16 * 1024))
    assert jnp.allclose(out3, ref, atol=1e-5, rtol=1e-5)

    # Forced HW tiling on HW=144: non-divisor 128 tile with masked ragged tail.
    out4 = jax.block_until_ready(channel_attention(x2, w1, w2, tile_target=16 * 1024))
    assert jnp.allclose(out4, _reference(x2, w1, w2), atol=1e-5, rtol=1e-5)

    print("KERNEL_OK")
</pallas_src>

<mosaic_0001>
module attributes {stable_mosaic.version = 11 : i64} {
  func.func @_channel_attention_kernel(%arg0: i32, %arg1: i32, %arg2: memref<1x32x256xf32, #tpu.memory_space<vmem>>, %arg3: memref<32x2xf32, #tpu.memory_space<vmem>>, %arg4: memref<2x32xf32, #tpu.memory_space<vmem>>, %arg5: memref<1x1x32xf32, #tpu.memory_space<vmem>>, %arg6: memref<1x32x128xf32, #tpu.memory_space<vmem>>, %arg7: memref<1x32x128xf32, #tpu.memory_space<vmem>>) attributes {dimension_semantics = [#tpu.dimension_semantics<parallel>, #tpu.dimension_semantics<arbitrary>], iteration_bounds = array<i64: 2, 1>, scalar_prefetch = 0 : i64, scratch_operands = 2 : i64, tpu.core_type = #tpu.core_type<tc>, window_params = [{transform_indices = @transform_0, window_bounds = array<i64: 1, 32, 256>}, {pipeline_mode = #tpu.pipeline_mode<synchronous>, transform_indices = @transform_1, window_bounds = array<i64: 32, 2>}, {pipeline_mode = #tpu.pipeline_mode<synchronous>, transform_indices = @transform_2, window_bounds = array<i64: 2, 32>}, {transform_indices = @transform_3, window_bounds = array<i64: 1, 1, 32>}]} {
    %c0_i32 = arith.constant 0 : i32
    %0 = arith.cmpi eq, %arg1, %c0_i32 : i32
    %1 = arith.extui %0 : i1 to i32
    %c0_i32_0 = arith.constant 0 : i32
    %2 = arith.cmpi ne, %1, %c0_i32_0 : i32
    scf.if %2 {
      %cst = arith.constant 0.000000e+00 : f32
      %16 = vector.broadcast %cst : f32 to vector<1x32x128xf32>
      %c0_19 = arith.constant 0 : index
      %c0_20 = arith.constant 0 : index
      %c0_21 = arith.constant 0 : index
      %17 = vector.load %arg6[%c0_19, %c0_20, %c0_21] : memref<1x32x128xf32, #tpu.memory_space<vmem>>, vector<1x32x128xf32>
      tpu.vector_store %arg6[%c0_19, %c0_20, %c0_21], %16 {strides = array<i32>} : memref<1x32x128xf32, #tpu.memory_space<vmem>>, vector<1x32x128xf32>,
      %cst_22 = arith.constant 0xFF800000 : f32
      %18 = vector.broadcast %cst_22 : f32 to vector<1x32x128xf32>
      %c0_23 = arith.constant 0 : index
      %c0_24 = arith.constant 0 : index
      %c0_25 = arith.constant 0 : index
      %19 = vector.load %arg7[%c0_23, %c0_24, %c0_25] : memref<1x32x128xf32, #tpu.memory_space<vmem>>, vector<1x32x128xf32>
      tpu.vector_store %arg7[%c0_23, %c0_24, %c0_25], %18 {strides = array<i32>} : memref<1x32x128xf32, #tpu.memory_space<vmem>>, vector<1x32x128xf32>,
    } else {
    }
    %c0 = arith.constant 0 : index
    %c0_1 = arith.constant 0 : index
    %c0_2 = arith.constant 0 : index
    %3 = vector.load %arg2[%c0, %c0_1, %c0_2] : memref<1x32x256xf32, #tpu.memory_space<vmem>>, vector<1x32x128xf32>
    %c0_3 = arith.constant 0 : index
    %c0_4 = arith.constant 0 : index
    %c128 = arith.constant 128 : index
    %4 = vector.load %arg2[%c0_3, %c0_4, %c128] : memref<1x32x256xf32, #tpu.memory_space<vmem>>, vector<1x32x128xf32>
    %5 = arith.addf %3, %4 : vector<1x32x128xf32>
    %6 = arith.maximumf %3, %4 : vector<1x32x128xf32>
    %c0_5 = arith.constant 0 : index
    %c0_6 = arith.constant 0 : index
    %c0_7 = arith.constant 0 : index
    %7 = vector.load %arg6[%c0_5, %c0_6, %c0_7] : memref<1x32x128xf32, #tpu.memory_space<vmem>>, vector<1x32x128xf32>
    %8 = arith.addf %7, %5 : vector<1x32x128xf32>
    %c0_8 = arith.constant 0 : index
    %c0_9 = arith.constant 0 : index
    %c0_10 = arith.constant 0 : index
    %9 = vector.load %arg6[%c0_8, %c0_9, %c0_10] : memref<1x32x128xf32, #tpu.memory_space<vmem>>, vector<1x32x128xf32>
    tpu.vector_store %arg6[%c0_8, %c0_9, %c0_10], %8 {strides = array<i32>} : memref<1x32x128xf32, #tpu.memory_space<vmem>>, vector<1x32x128xf32>,
    %c0_11 = arith.constant 0 : index
    %c0_12 = arith.constant 0 : index
    %c0_13 = arith.constant 0 : index
    %10 = vector.load %arg7[%c0_11, %c0_12, %c0_13] : memref<1x32x128xf32, #tpu.memory_space<vmem>>, vector<1x32x128xf32>
    %11 = arith.maximumf %10, %6 : vector<1x32x128xf32>
    %c0_14 = arith.constant 0 : index
    %c0_15 = arith.constant 0 : index
    %c0_16 = arith.constant 0 : index
    %12 = vector.load %arg7[%c0_14, %c0_15, %c0_16] : memref<1x32x128xf32, #tpu.memory_space<vmem>>, vector<1x32x128xf32>
    tpu.vector_store %arg7[%c0_14, %c0_15, %c0_16], %11 {strides = array<i32>} : memref<1x32x128xf32, #tpu.memory_space<vmem>>, vector<1x32x128xf32>,
    %c0_i32_17 = arith.constant 0 : i32
    %13 = arith.cmpi eq, %arg1, %c0_i32_17 : i32
    %14 = arith.extui %13 : i1 to i32
    %c0_i32_18 = arith.constant 0 : i32
    %15 = arith.cmpi ne, %14, %c0_i32_18 : i32
    scf.if %15 {
      %c0_19 = arith.constant 0 : index
      %c0_20 = arith.constant 0 : index
      %c0_21 = arith.constant 0 : index
      %16 = vector.load %arg6[%c0_19, %c0_20, %c0_21] : memref<1x32x128xf32, #tpu.memory_space<vmem>>, vector<1x32x128xf32>
      %cst = arith.constant dense<0.000000e+00> : vector<1x32xf32>
      %17 = vector.multi_reduction <add>, %16, %cst [2] : vector<1x32x128xf32> to vector<1x32xf32>
      %cst_22 = arith.constant 3.906250e-03 : f32
      %18 = vector.broadcast %cst_22 : f32 to vector<1x32xf32>
      %19 = arith.mulf %17, %18 : vector<1x32xf32>
      %c0_23 = arith.constant 0 : index
      %c0_24 = arith.constant 0 : index
      %c0_25 = arith.constant 0 : index
      %20 = vector.load %arg7[%c0_23, %c0_24, %c0_25] : memref<1x32x128xf32, #tpu.memory_space<vmem>>, vector<1x32x128xf32>
      %cst_26 = arith.constant dense<0xFF800000> : vector<1x32xf32>
      %21 = vector.multi_reduction <maximumf>, %20, %cst_26 [2] : vector<1x32x128xf32> to vector<1x32xf32>
      %c0_27 = arith.constant 0 : index
      %c0_28 = arith.constant 0 : index
      %22 = vector.load %arg3[%c0_27, %c0_28] : memref<32x2xf32, #tpu.memory_space<vmem>>, vector<32x2xf32>
      %c0_29 = arith.constant 0 : index
      %c0_30 = arith.constant 0 : index
      %23 = vector.load %arg4[%c0_29, %c0_30] : memref<2x32xf32, #tpu.memory_space<vmem>>, vector<2x32xf32>
      %24 = tpu.concatenate %19, %21 in 0 : vector<1x32xf32>, vector<1x32xf32> -> vector<2x32xf32>
      %cst_31 = arith.constant dense<0.000000e+00> : vector<2x2xf32>
      %25 = tpu.matmul %24, %22, %cst_31 {dimension_numbers = #tpu.dot_dimension_numbers<[1], [0], [0], [1], [0, 0, 1, 1], [], []>} : vector<2x32xf32>, vector<32x2xf32>, vector<2x2xf32> -> vector<2x2xf32>
      %cst_32 = arith.constant 0.000000e+00 : f32
      %26 = vector.broadcast %cst_32 : f32 to vector<2x2xf32>
      %27 = arith.maximumf %25, %26 : vector<2x2xf32>
      %cst_33 = arith.constant dense<0.000000e+00> : vector<2x32xf32>
      %28 = tpu.matmul %27, %23, %cst_33 {dimension_numbers = #tpu.dot_dimension_numbers<[1], [0], [0], [1], [0, 0, 1, 1], [], []>} : vector<2x2xf32>, vector<2x32xf32>, vector<2x32xf32> -> vector<2x32xf32>
      %29 = vector.extract_strided_slice %28 {offsets = [0, 0], sizes = [1, 32], strides = [1, 1]} : vector<2x32xf32> to vector<1x32xf32>
      %30 = vector.extract_strided_slice %28 {offsets = [1, 0], sizes = [1, 32], strides = [1, 1]} : vector<2x32xf32> to vector<1x32xf32>
      %31 = arith.addf %29, %30 : vector<1x32xf32>
      %32 = arith.negf %31 : vector<1x32xf32>
      %33 = math.exp %32 : vector<1x32xf32>
      %cst_34 = arith.constant 1.000000e+00 : f32
      %34 = vector.broadcast %cst_34 : f32 to vector<1x32xf32>
      %35 = arith.addf %34, %33 : vector<1x32xf32>
      %36 = arith.divf %34, %35 : vector<1x32xf32>
      %37 = vector.shape_cast %36 : vector<1x32xf32> to vector<1x1x32xf32>
      %c0_35 = arith.constant 0 : index
      %c0_36 = arith.constant 0 : index
      %c0_37 = arith.constant 0 : index
      %38 = vector.load %arg5[%c0_35, %c0_36, %c0_37] : memref<1x1x32xf32, #tpu.memory_space<vmem>>, vector<1x1x32xf32>
      tpu.vector_store %arg5[%c0_35, %c0_36, %c0_37], %37 {strides = array<i32>} : memref<1x1x32xf32, #tpu.memory_space<vmem>>, vector<1x1x32xf32>,
    } else {
    }
    return
  }
  func.func @transform_0(%arg0: i32, %arg1: i32) -> (i32, i32, i32) {
    %c0_i32 = arith.constant 0 : i32
    %c0_i32_0 = arith.constant 0 : i32
    return %arg0, %c0_i32, %arg1 : i32, i32, i32
  }
  func.func @transform_1(%arg0: i32, %arg1: i32) -> (i32, i32) {
    %c0_i32 = arith.constant 0 : i32
    %c0_i32_0 = arith.constant 0 : i32
    %c0_i32_1 = arith.constant 0 : i32
    return %c0_i32, %c0_i32_0 : i32, i32
  }
  func.func @transform_2(%arg0: i32, %arg1: i32) -> (i32, i32) {
    %c0_i32 = arith.constant 0 : i32
    %c0_i32_0 = arith.constant 0 : i32
    %c0_i32_1 = arith.constant 0 : i32
    return %c0_i32, %c0_i32_0 : i32, i32
  }
  func.func @transform_3(%arg0: i32, %arg1: i32) -> (i32, i32, i32) {
    %c0_i32 = arith.constant 0 : i32
    %c0_i32_0 = arith.constant 0 : i32
    %c0_i32_1 = arith.constant 0 : i32
    return %arg0, %c0_i32, %c0_i32_0 : i32, i32, i32
  }
}

</mosaic_0001>

<bundles_post_ra>
// kernel: tpu_custom_call.1
= control target key start
LH: loop header
LB: loop body
LE: loop exit
PB: predicated region body
PF: predicated region fallthrough
CT: control target
= control target key end

     0   :  { %8 = vsyncpa [#allocation5], 0  ;;  %s1055_s0 = inlined_call_operand.hbm [shape: f32[2,32,256], index: 0, kind: input, shape index: {}]   ;;  %s1056_s1 = inlined_call_operand.vmem [shape: f32[32,2], index: 1, kind: input, shape index: {}]   ;;  %s1057_s2 = inlined_call_operand.vmem [shape: f32[2,32], index: 2, kind: input, shape index: {}]   ;;  %s1058_s3 = inlined_call_operand.hbm [shape: f32[2,1,32], index: 3, kind: output, shape index: {}]  }
   0x1   :  { %10 = vsyncpa [#allocation5 + $0x1], 0 }
   0x2   :  { %11 = vsyncpa [#allocation6], 0 }
   0x3   :  { %13 = vsyncpa [#allocation6 + $0x1], 0  ;;  %s864_s12 = smov 0   ;;  %s866_s13 = smov 0  }
   0x4   :  { %s868_s14 = smov 0   ;;  %s870_s15 = smov 0  }
   0x5   :  { %s872_s16 = smov 0   ;;  %s874_s17 = smov 0  }
   0x6 LB: > { %s606_s18 = sadd.s32 4294967295, %s835_s17   ;;  %s607_s19 = sadd.s32 4294967294, %s835_s17   ;;  %s835_s17 = sphi %s874_s17, %s19_s17   ;;  %s831_s16 = sphi %s872_s16, %s1073_s16   ;;  %s827_s15 = sphi %s870_s15, %s1072_s15   ;;  %s823_s14 = sphi %s868_s14, %s1071_s14   ;;  %s819_s13 = sphi %s866_s13, %s1070_s13   ;;  %s815_s12 = sphi %s864_s12, %s1069_s12  }
   0x7   : > { %s31_s20 = sadd.s32 1, %s831_s16  ;;  %s40_s21 = sadd.s32 1, %s823_s14 }
   0x8   : > { %p33_p0 = scmp.ge.s32.totalorder %s31_s20, 2  ;;  %p47_p1 = scmp.ne.s32.totalorder %s823_s14, %s819_s13 }
   0x9   : > { %p48_p2 = scmp.eq.s32.totalorder %s835_s17, 0  ;;  %p53_p3 = scmp.ne.s32.totalorder %s819_s13, %s815_s12 }
   0xa   : > { %s1075_s20 = smov (%p33_p0, %s31_s20), 0  ;;  %p54_p5 = scmp.eq.s32.totalorder %s606_s18, 0 }
   0xb   : > { %p905_p4 = por %p48_p2, %p47_p1  ;;  %s35_s23 = ssub.s32 %s831_s16, %s1075_s20 }
   0xc   : > { %p119_p6 = scmp.eq.s32.totalorder %s606_s18, 1  ;;  %p38_p7 = scmp.eq.s32.totalorder %s35_s23, 0 }
   0xd   : > { %p911_p8 = por %p54_p5, %p53_p3  ;;  %p125_p10 = scmp.eq.s32.totalorder %s607_s19, 1 }
   0xe   : > { %p915_p9 = por %p119_p6, %p47_p1  ;;  %p664_p13 = scmp.lt.s32.totalorder %s835_s17, 2 }
   0xf   : > { %s920_s26 = scalar_select %p38_p7, %s823_s14, %s40_s21  }
  0x10   : > { %s1062_s25 = scalar_select %p915_p9, 1, 0 }
  0x11   : > { %p922_p11 = por %p125_p10, %p53_p3  ;;  %s151_s28 = sand.u32 1, %s823_s14  }
  0x12   : > { %s610_s29 = sshll.u32 %s151_s28, 6  ;;  %s622_s30 = sshll.u32 %s831_s16, 10 }
  0x13   : > { %s1063_s27 = scalar_select %p922_p11, 1, 0 }
  0x14   : > { %s933_s6 = scalar_lea.hbm %s1055_s0, %s622_s30  ;;  %s155_s7 = scalar_lea.vmem [#allocation4], %s610_s29 }
  0x15   : > { %s164_s8 = sshll.u32 %s155_s7, 4  ;;  %p939_p0 = pnand %p664_p13, %p905_p4  ;;  %s935_s8 = int_to_ptr.vmem [resolvable:$true] %s164_s8 }
  0x16   : > { %s944_s10 = scalar_lea.sflag [#allocation5], %s151_s28  ;;  %s723_s11 = scalar_lea.hbm %s933_s6, 1024 }
  0x17   : > { %p724_p2 = scmp.ne.s32.totalorder %s933_s6, %s723_s11  ;;  %p725_p3 = pneg %p939_p0 }
  0x18   : > { %s728_s21 = scalar_lea.hbm %s1055_s0, 2048  ;;  %p729_p4 = scmp.lt.u32.totalorder %s933_s6, %s1055_s0 }
  0x19   : > { %p726_p5 = pnand %p725_p3, %p724_p2  ;;  %p730_p7 = scmp.lt.u32.totalorder %s728_s21, %s723_s11 }
  0x1a   : > { %p732_p13 = scmp.lt.u32.totalorder %s723_s11, %s933_s6 }
  0x1b   : > { %p727_p6 = pneg %p726_p5  ;;  %p731_p10 = por %p730_p7, %p729_p4 }
  0x1d   : > { %p733_p12 = por %p732_p13, %p731_p10 }
  0x1f   : > { %p734_p1 = pnand %p733_p12, %p727_p6 }
  0x21   : > { %737 = shalt.err (!%p734_p1)
}
  0x22   : > { %s738_s28 = scalar_lea.vmem %s935_s8, 1024  ;;  %s837_s29 = smov [#allocation4]  }
  0x23   : > { %p739_p2 = scmp.ne.s32.totalorder %s935_s8, %s738_s28  ;;  %s743_s30 = sshll.u32 %s837_s29, 4  ;;  %s744_s30 = int_to_ptr.vmem [resolvable:$false] %s743_s30 }
  0x24   : > { %s745_s4 = scalar_lea.vmem %s744_s30, 2048  ;;  %p746_p9 = scmp.lt.s32.totalorder %s935_s8, %s744_s30 }
  0x25   : > { %p741_p5 = pnand %p739_p2, %p725_p3  ;;  %p747_p4 = scmp.lt.s32.totalorder %s745_s4, %s738_s28 }
  0x27   : > { %p742_p11 = pneg %p741_p5  ;;  %p748_p7 = por %p747_p4, %p746_p9 }
  0x29   : > { %p749_p10 = pnand %p748_p7, %p742_p11 }
  0x2b   : > { %752 = shalt.err (!%p749_p10)
}
  0x2c   : > { %s838_s5 = smov 256   ;;  %s839_s7 = smov 16  }
  0x2d   : > { %659 = dma.hbm_to_vmem [thread:$0]  (!%p939_p0), %s933_s6, 1024, %s935_s8, %s944_s10, %s838_s5, %s838_s5, %s839_s7  }
  0x2e   : > { %p172_p12 = scmp.lt.s32.totalorder %s835_s17, 3  ;;  %p1065_p1 = scmp.ge.s32.totalorder %s835_s17, 1 }
  0x30   : > { %p173_p3 = pnand %p1065_p1, %p172_p12 }
  0x31   : > { %s976_s11 = sand.u32 (!%p173_p3), 1, %s819_s13  }
  0x32   : > { %176 = sbr.rel (%p173_p3) target bundleno = 691 (0x2b3), region = 32  ;;  %s614_s18 = sshll.u32 (!%p173_p3), %s976_s11, 6 }
  0x33   : > { %s179_s19 = scalar_lea.sflag (!%p173_p3), [#allocation5], %s976_s11  ;;  %s182_s21 = scalar_lea.vmem (!%p173_p3), [#allocation4], %s614_s18 }
  0x39   : > { %806 = dma.done.wait (%p911_p8), %s179_s19, 1024  }
  0x3a   : > { %808 = vsyncadd (%p911_p8), %s179_s19, 4294966272  ;;  %v219_v0 = vld [vmem:[%s182_s21 + $0x20] sm:$0xff]  ;;  %v223_v1 = vld [vmem:[%s182_s21 + $0x28] sm:$0xff]  ;;  %v840_v19 = vmov 0.0|0.0   ;;  %vm841_vm0 = vmmov 0   ;;  %v842_v23 = vmov 0.0   ;;  %v297_v24 = vlaneseq }
  0x3b   : > { %v217_v2 = vld [vmem:[%s182_s21] sm:$0xff]  ;;  %v227_v3 = vadd.f32 %v223_v1, %v219_v0  ;;  %v221_v4 = vld [vmem:[%s182_s21 + $0x8] sm:$0xff]  ;;  %v220_v5 = vld [vmem:[%s182_s21 + $0x30] sm:$0xff]  ;;  %v231_v15 = vmax.f32 %v219_v0, %v223_v1  ;;  %646 = vmatprep.subr.bf16.mxu0 %v840_v19  ;;  %638 = vmatprep.mubr.msk.f32.mxu0 %vm841_vm0, %v842_v23  ;;  %vm308_vm1 = vcmask 130112   ;;  %vm315_vm2 = vcmask 195712   ;;  %s619_s4 = sshll.u32 %s827_s15, 4 }
  0x3c   : > { %v224_v6 = vld [vmem:[%s182_s21 + $0x38] sm:$0xff]  ;;  %v225_v7 = vadd.f32 %v221_v4, %v217_v2  ;;  %v218_v8 = vld [vmem:[%s182_s21 + $0x10] sm:$0xff]  ;;  %v229_v13 = vmax.f32 %v217_v2, %v221_v4  ;;  %v288_v16 = vld [vmem:[%s1056_s1] sm:$0xff]  ;;  %641 = vmatprep.subr.mxu1 %v842_v23  ;;  %643 = vmatprep.mubr.msk.f32.mxu1 %vm841_vm0, %v842_v23  ;;  %v298_v25 = vand.u32 127, %v297_v24  ;;  %v300_v28 = vshrl.u32 %v297_v24, 7  ;;  %s203_s5 = scalar_lea.vmem [#allocation7], %s976_s11 }
  0x3d   : > { %v222_v9 = vld [vmem:[%s182_s21 + $0x18] sm:$0xff]  ;;  %268 = vadd.xlane.f32.xlu1 %v227_v3  ;;  %v228_v10 = vadd.f32 %v224_v6, %v220_v5  ;;  %v232_v14 = vmax.f32 %v220_v5, %v224_v6  ;;  %v289_v17 = vld [vmem:[%s1056_s1 + $0x8] sm:$0xff]  ;;  %v290_v20 = vld [vmem:[%s1056_s1 + $0x10] sm:$0xff]  ;;  %vm322_vm3 = vcmask 261312   ;;  %vm349_vm4 = vcmask 1040384   ;;  %s529_s7 = sshll.u32 %s203_s5, 4  ;;  %s1006_s21 = scalar_lea.hbm %s1058_s3, %s619_s4  ;;  %s1008_s7 = int_to_ptr.vmem [resolvable:$true] %s529_s7 }
  0x3e   : > { %264 = vadd.xlane.f32.xlu0 %v225_v7  ;;  %v226_v11 = vadd.f32 %v222_v9, %v218_v8  ;;  %v230_v12 = vmax.f32 %v218_v8, %v222_v9  ;;  %v647_v18 = vpack.c.bf16 %v289_v17, %v288_v16  ;;  %v291_v21 = vld [vmem:[%s1056_s1 + $0x18] sm:$0xff]  ;;  %v303_v27 = vadd.s32 4294967288, %v298_v25  ;;  %v292_v61 = vld [vmem:[%s1057_s2] sm:$0x3]  ;;  %s517_s24 = scalar_lea.sflag [#allocation6], %s976_s11  ;;  %s753_s6 = scalar_lea.vmem %s1008_s7, 16 }
  0x3f   : > { %v650_v22 = vpack.c.bf16 %v291_v21, %v290_v20  ;;  %v310_v30 = vadd.s32 4294967280, %v298_v25  ;;  %v301_v33 = vsub.s32 %v298_v25, %v300_v28  ;;  %v317_v35 = vadd.s32 4294967272, %v298_v25  ;;  %p754_p8 = scmp.ne.s32.totalorder %s1008_s7, %s753_s6  ;;  %p1066_p9 = scmp.ne.s32.totalorder %s1062_s25, 0 }
  0x40   : > { %648 = vmatpush3.bf16.msra.mxu0 %v647_v18  ;;  %v306_v32 = vsub.s32 %v303_v27, %v300_v28  ;;  %vm351_vm5 = vcmask 261120   ;;  %vm430_vm6 = vcmask 1041408   ;;  %vm426_vm7 = vcmask 15360   ;;  %s843_s15 = smov [#allocation7]  }
  0x41   : > { %270 = vadd.xlane.f32.xlu1 %v228_v10  ;;  %649 = vmatprep.subr.bf16.mxu0 %v840_v19  ;;  %v313_v38 = vsub.s32 %v310_v30, %v300_v28  ;;  %v320_v43 = vsub.s32 %v317_v35, %v300_v28  ;;  %vm514_vm8 = vcmask 253952   ;;  %p755_p11 = pnand %p754_p8, %p1066_p9  ;;  %s757_s8 = sshll.u32 %s843_s15, 4  ;;  %s758_s8 = int_to_ptr.vmem [resolvable:$false] %s757_s8 }
  0x42   : > { %266 = vadd.xlane.f32.xlu0 %v226_v11  ;;  %642 = vmatpush3.msk.msra.mxu1 %vm430_vm6, %v292_v61  ;;  %s759_s9 = scalar_lea.vmem %s758_s8, 32  ;;  %p760_p6 = scmp.lt.s32.totalorder %s1008_s7, %s758_s8 }
  0x43   : > { %p756_p0 = pneg %p755_p11  ;;  %p761_p13 = scmp.lt.s32.totalorder %s759_s9, %s753_s6 }
  0x44   : > { %651 = vmatpush3.bf16.msra.mxu0 %v650_v22 }
  0x45   : > { %282 = vmax.xlane.f32.xlu1 %v230_v12  ;;  %p762_p2 = por %p761_p13, %p760_p6 }
  0x46   : > { %280 = vmax.xlane.f32.xlu0 %v229_v13 }
  0x47   : > { %p763_p5 = pnand %p762_p2, %p756_p0 }
  0x49   : > { %286 = vmax.xlane.f32.xlu1 %v232_v14 }
  0x4a   : > { %284 = vmax.xlane.f32.xlu0 %v231_v15 }
  0xca   : > { %v269_v26 = vpop.xlane.xlu1 %268 }
  0xcb   : > { %v265_v29 = vpop.xlane.xlu0 %264  ;;  %v274_v39 = vmul.f32 0.00390625, %v269_v26 }
  0xcc   : > { %v272_v34 = vmul.f32 0.00390625, %v265_v29 }
  0xcd   : > { %v314_v49 = vrot.slane %v274_v39, %v313_v38 }
  0xce   : > { %v271_v31 = vpop.xlane.xlu1 %270  ;;  %v302_v42 = vrot.slane %v272_v34, %v301_v33 }
  0xcf   : > { %v267_v36 = vpop.xlane.xlu0 %266  ;;  %v275_v44 = vmul.f32 0.00390625, %v271_v31 }
  0xd0   : > { %v273_v37 = vmul.f32 0.00390625, %v267_v36 }
  0xd1   : > { %v321_v51 = vrot.slane %v275_v44, %v320_v43 }
  0xd2   : > { %v307_v40 = vrot.slane %v273_v37, %v306_v32  ;;  %v283_v41 = vpop.xlane.xlu1 %282 }
  0xd3   : > { %v281_v45 = vpop.xlane.xlu0 %280  ;;  %v336_v47 = vrot.slane %v283_v41, %v306_v32 }
  0xd4   : > { %v309_v46 = vsel %vm308_vm1, %v307_v40, %v302_v42  ;;  %v332_v48 = vrot.slane %v281_v45, %v301_v33 }
  0xd5   : > { %v316_v55 = vsel %vm315_vm2, %v314_v49, %v309_v46 }
  0xd6   : > { %v287_v50 = vpop.xlane.xlu1 %286  ;;  %v337_v56 = vsel %vm308_vm1, %v336_v47, %v332_v48  ;;  %v323_v59 = vsel %vm322_vm3, %v321_v51, %v316_v55 }
  0xd7   : > { %v285_v52 = vpop.xlane.xlu0 %284  ;;  %v346_v53 = vrot.slane %v287_v50, %v320_v43 }
  0xd8   : > { %v341_v54 = vrot.slane %v285_v52, %v313_v38 }
  0xda   : > { %v342_v57 = vsel %vm315_vm2, %v341_v54, %v337_v56 }
  0xdb   : > { %v347_v58 = vsel %vm322_vm3, %v346_v53, %v342_v57 }
  0xdc   : > { %v350_v60 = vsel %vm349_vm4, %v323_v59, %v347_v58 }
  0xdd   : > { %639 = vmatmul.mubr.msk.f32.vlgmr.msra.gmra.mrb[0].mxu0 %vm351_vm5, %v350_v60 }
 0x1b0   : > { %v421_v62 = vpop.f32.mrb[0].mxu0 }
 0x1b1   : > { %v425_v63 = vmax.f32 %v421_v62, 0.0  ;;  %v640_v0 = vpop.f32.mrb[1].mxu0 }
 0x1b3   : > { %644 = vmatmul.mubr.msk.f32.vlgmr.msra.gmra.mrb[0].mxu1 %vm426_vm7, %v425_v63 }
 0x286   : > { %v500_v1 = vpop.f32.mrb[0].mxu1 }
 0x287   : > { %v505_v2 = vrot.slane %v500_v1, 1  ;;  %v645_v3 = vpop.f32.mrb[1].mxu1 }
 0x289   : > { %v507_v4 = vadd.f32 %v505_v2, %v500_v1 }
 0x28b   : > { %v618_v5 = vmul.f32 -1.442695, %v507_v4 }
 0x28d   : > { %719 = vpow2.f32 %v618_v5 }
 0x297   : > { %v720_v6 = vpop.eup %719 }
 0x298   : > { %v511_v7 = vadd.f32 1.0, %v720_v6 }
 0x29a   : > { %721 = vrcp.f32 %v511_v7 }
 0x2a4   : > { %v722_v8 = vpop.eup %721 }
 0x2a5   : > { %515 = vst.msk [vmem:[%s203_s5] sm:$0x1] %vm514_vm8, %v722_v8 }
 0x2a6   : > { %766 = shalt.err (!%p763_p5)
}
 0x2a7   : > { %s767_s11 = scalar_lea.hbm %s1006_s21, 16  ;;  %s771_s23 = scalar_lea.hbm %s1058_s3, 32 }
 0x2a8   : > { %p768_p4 = scmp.ne.s32.totalorder %s1006_s21, %s767_s11  ;;  %p772_p12 = scmp.lt.u32.totalorder %s1006_s21, %s1058_s3 }
 0x2a9   : > { %p773_p1 = scmp.lt.u32.totalorder %s771_s23, %s767_s11  ;;  %p775_p8 = scmp.lt.u32.totalorder %s767_s11, %s1006_s21 }
 0x2aa   : > { %p769_p7 = pnand %p768_p4, %p1066_p9 }
 0x2ab   : > { %p774_p3 = por %p773_p1, %p772_p12 }
 0x2ac   : > { %p770_p10 = pneg %p769_p7 }
 0x2ad   : > { %p776_p11 = por %p775_p8, %p774_p3 }
 0x2af   : > { %p777_p0 = pnand %p776_p11, %p770_p10 }
 0x2b1   : > { %780 = shalt.err (!%p777_p0)
}
 0x2b2   : > { %654 = dma.vmem_to_hbm [thread:$0]  (%p1066_p9), %s1008_s7, 16, %s1006_s21, %s517_s24  }
 0x2b3 PF: > { %s541_s30 = sand.u32 1, %s815_s12   ;;  %p1067_p6 = scmp.ne.s32.totalorder %s1063_s27, 0 }
 0x2b4   : > { %p1068_p13 = scmp.ge.s32.totalorder %s835_s17, 2  ;;  %s542_s4 = scalar_lea.sflag [#allocation6], %s541_s30 }
 0x2b6   : > { %p661_p2 = pnand %p1068_p13, %p1067_p6 }
 0x2b8   : > { %810 = dma.done.wait (!%p661_p2), %s542_s4, 16  }
 0x2b9   : > { %812 = vsyncadd (!%p661_p2), %s542_s4, 4294967280  ;;  %s19_s17 = sadd.s32 1, %s835_s17   ;;  %s1069_s12 = smov %s819_s13 }
 0x2ba   : > { %p16_p5 = scmp.ge.s32.totalorder %s19_s17, 4   ;;  %s1070_s13 = smov %s823_s14 }
 0x2bb   : > { %s1071_s14 = smov %s920_s26  ;;  %s1072_s15 = smov %s831_s16 }
 0x2bc   : > { %s1073_s16 = smov %s1075_s20  ;;  %18 = sbr.rel (!%p16_p5) target bundleno = 6 (0x6), region = 85 }
 0x2c3   :  { %546 = vsyncpa [#allocation5], 1 }
 0x2c4   :  { %548 = vsyncpa [#allocation5 + $0x1], 1 }
 0x2c5   :  { %549 = vsyncpa [#allocation6], 1 }
 0x2c6   :  { %551 = vsyncpa [#allocation6 + $0x1], 1 }

</bundles_post_ra>
